<compile_context>
chip_gen: v7x
topology: tpu7x:2x2x1
jax: 0.10.0
libtpu: 0.0.40
codegen_flags: <defaults>
</compile_context>

<pallas_src>
import jax
import jax.numpy as jnp
import numpy as np
from jax.experimental import pallas as pl
from jax.experimental.pallas import tpu as pltpu

BN_EPS = 1e-5


def conv_layer_kernel(x_ref, w_ref, g_ref, beta_ref, o_ref, pool_ref):
    # x_ref:    [B, L, C]      input, channels-last (C on lanes, L on sublanes)
    # w_ref:    [3*C, C]       conv taps, im2col layout (row = k*C + c_in)
    # g_ref:    [1, 1, C]      batchnorm gamma
    # beta_ref: [1, 1, C]      batchnorm beta
    # o_ref:    [B, Lout, C]   pooled output (stride-2 pick done in-kernel)
    # pool_ref: [B, Lc, C]     VMEM scratch: sliding 3-window max
    x = x_ref[...]
    B, L, C = x.shape
    Lc = L + 2                    # circular pad 2 each side, valid k=3 conv
    Lout = (Lc - 1) // 2 + 1      # MaxPool1d(k=3, s=2, p=1) output length

    # --- im2col, kept 3-D (no unaligned (B*Lc) merge): tap k of output t
    #     reads x[(t + k - 2) mod L]; the circular pad is folded into the
    #     concats.  Taps stacked on the lane axis -> contraction dim 3C.
    cols = jnp.concatenate(
        [
            jnp.concatenate([x[:, L - 2:, :], x], axis=1),               # k = 0
            jnp.concatenate([x[:, L - 1:, :], x, x[:, :1, :]], axis=1),  # k = 1
            jnp.concatenate([x, x[:, :2, :]], axis=1),                   # k = 2
        ],
        axis=-1,
    )                                                        # [B, Lc, 3C]

    # --- Conv1d(k=3) as ONE batched MXU contraction, f32 accumulate.
    #     (conv bias omitted: cancelled exactly by BN's mean subtraction)
    w3 = jnp.broadcast_to(w_ref[...], (B, 3 * C, C))
    acc = jnp.einsum("blk,bkc->blc", cols, w3,
                     preferred_element_type=jnp.float32)     # [B, Lc, C]

    # --- BatchNorm1d (training mode): biased stats over the B*Lc rows,
    #     folded into a single per-channel scale/shift.
    n = jnp.float32(B * Lc)
    mean = jnp.sum(acc, axis=(0, 1), keepdims=True) / n      # [1, 1, C]
    ex2 = jnp.sum(acc * acc, axis=(0, 1), keepdims=True) / n
    var = ex2 - mean * mean
    s = g_ref[...] * jax.lax.rsqrt(var + BN_EPS)
    t = beta_ref[...] - mean * s
    yn = acc * s + t

    # --- ELU(alpha=1).  exp(min(x,0))-1 stays well within 1e-4 of expm1.
    y = jnp.where(yn > 0, yn, jnp.exp(jnp.minimum(yn, 0.0)) - 1.0)

    # --- MaxPool1d(k=3, s=2, p=1): sliding 3-window max for every position
    #     via XLU rolls + iota boundary masks (no concats), then the stride-2
    #     pick straight out of VMEM scratch with a strided ref read.
    row = jax.lax.broadcasted_iota(jnp.int32, (B, Lc, C), 1)
    ninf = jnp.float32(-jnp.inf)
    y_prev = jnp.where(row == 0, ninf, pltpu.roll(y, shift=1, axis=1))       # y[j-1]
    y_next = jnp.where(row == Lc - 1, ninf, pltpu.roll(y, shift=Lc - 1, axis=1))  # y[j+1]
    pool_ref[...] = jnp.maximum(jnp.maximum(y_prev, y), y_next)
    # out[t] = max(y[2t-1], y[2t], y[2t+1]) = sliding_max[2t]
    o_ref[...] = pool_ref[:, pl.ds(0, Lout, stride=2), :]


def conv_layer_forward(x, W, b, gamma, beta):
    """x: [B, L, C] f32.  W: [C_out, C_in, 3] (PyTorch Conv1d weight layout).

    `b` (the Conv1d bias) is accepted for signature parity with the PyTorch
    module but NOT passed to the kernel: training-mode BatchNorm subtracts the
    per-channel batch mean, which cancels a per-channel bias exactly.
    """
    del b
    B, L, C = x.shape
    Lc = L + 2
    Lout = (Lc - 1) // 2 + 1
    # im2col weight layout: w_f[k*C + c_in, c_out] = W[c_out, c_in, k]
    w_f = jnp.transpose(W, (2, 1, 0)).reshape(3 * C, C).astype(jnp.float32)
    g3 = gamma.reshape(1, 1, C).astype(jnp.float32)
    beta3 = beta.reshape(1, 1, C).astype(jnp.float32)
    return pl.pallas_call(
        conv_layer_kernel,
        out_shape=jax.ShapeDtypeStruct((B, Lout, C), jnp.float32),
        in_specs=[pl.BlockSpec(memory_space=pltpu.MemorySpace.VMEM)] * 4,
        out_specs=pl.BlockSpec(memory_space=pltpu.MemorySpace.VMEM),
        scratch_shapes=[pltpu.VMEM((B, Lc, C), jnp.float32)],
    )(x.astype(jnp.float32), w_f, g3, beta3)


def conv_layer_ref(x, W, b, gamma, beta):
    """Pure-JAX reference mirroring the PyTorch module (NCL layout, with bias)."""
    xt = jnp.transpose(x, (0, 2, 1))                              # [B, C, L]
    xp = jnp.concatenate([xt[:, :, -2:], xt, xt[:, :, :2]], axis=2)
    y = jax.lax.conv_general_dilated(
        xp, W, window_strides=(1,), padding="VALID",
        dimension_numbers=("NCH", "OIH", "NCH"),
        precision=jax.lax.Precision.HIGHEST) + b[None, :, None]
    mean = y.mean(axis=(0, 2), keepdims=True)
    var = ((y - mean) ** 2).mean(axis=(0, 2), keepdims=True)
    yn = (y - mean) / jnp.sqrt(var + BN_EPS) * gamma[None, :, None] + beta[None, :, None]
    ye = jnp.where(yn > 0, yn, jnp.expm1(yn))
    zp = jnp.pad(ye, ((0, 0), (0, 0), (1, 1)), constant_values=-jnp.inf)
    Lc = ye.shape[2]
    Lout = (Lc - 1) // 2 + 1
    out = jnp.stack(
        [jnp.max(zp[:, :, 2 * t:2 * t + 3], axis=2) for t in range(Lout)], axis=2)
    return jnp.transpose(out, (0, 2, 1))                          # [B, Lout, C]


if __name__ == "__main__":
    B, L, C = 2, 16, 128  # batch, seq_len, c_in (C = full 128-lane width)
    key = jax.random.PRNGKey(0)
    kx, kw, kb, kg, kbe = jax.random.split(key, 5)

    # Inputs/weights rounded to bf16-representable f32 values so the parity
    # check is independent of the backend's f32-matmul emulation policy
    # (XLA conv vs Mosaic MXU passes): every path then computes exact products
    # and only f32 accumulation order differs (~1e-6).
    x = jax.random.normal(kx, (B, L, C), jnp.float32)
    x = x.astype(jnp.bfloat16).astype(jnp.float32)

    bound = 1.0 / np.sqrt(C * 3)
    W = jax.random.uniform(kw, (C, C, 3), jnp.float32, -bound, bound)  # [C_out, C_in, 3]
    W = W.astype(jnp.bfloat16).astype(jnp.float32)
    b = jax.random.uniform(kb, (C,), jnp.float32, -bound, bound)       # cancelled by BN
    # Fresh BatchNorm1d has gamma=1 / beta=0; use non-trivial values so the
    # folded scale/shift path is actually exercised by the parity test.
    gamma = jax.random.uniform(kg, (C,), jnp.float32, 0.5, 1.5)
    beta = jax.random.uniform(kbe, (C,), jnp.float32, -0.5, 0.5)

    out = jax.block_until_ready(conv_layer_forward(x, W, b, gamma, beta))
    ref = jax.block_until_ready(conv_layer_ref(x, W, b, gamma, beta))

    expected_lout = (L + 2 - 1) // 2 + 1
    assert out.shape == (B, expected_lout, C), out.shape
    np.testing.assert_allclose(np.asarray(out), np.asarray(ref), rtol=1e-4, atol=1e-4)
    print("KERNEL_OK")
</pallas_src>

<mosaic_0001>
module attributes {stable_mosaic.version = 11 : i64} {
  func.func @conv_layer_kernel(%arg0: memref<2x16x128xf32, #tpu.memory_space<vmem>>, %arg1: memref<384x128xf32, #tpu.memory_space<vmem>>, %arg2: memref<1x1x128xf32, #tpu.memory_space<vmem>>, %arg3: memref<1x1x128xf32, #tpu.memory_space<vmem>>, %arg4: memref<2x9x128xf32, #tpu.memory_space<vmem>>, %arg5: memref<2x18x128xf32, #tpu.memory_space<vmem>>) attributes {dimension_semantics = [], scalar_prefetch = 0 : i64, scratch_operands = 1 : i64, tpu.core_type = #tpu.core_type<tc>} {
    %c0 = arith.constant 0 : index
    %c0_0 = arith.constant 0 : index
    %c0_1 = arith.constant 0 : index
    %0 = vector.load %arg0[%c0, %c0_0, %c0_1] : memref<2x16x128xf32, #tpu.memory_space<vmem>>, vector<2x16x128xf32>
    %1 = vector.extract_strided_slice %0 {offsets = [0, 14, 0], sizes = [2, 2, 128], strides = [1, 1, 1]} : vector<2x16x128xf32> to vector<2x2x128xf32>
    %2 = tpu.concatenate %1, %0 in 1 : vector<2x2x128xf32>, vector<2x16x128xf32> -> vector<2x18x128xf32>
    %3 = vector.extract_strided_slice %0 {offsets = [0, 15, 0], sizes = [2, 1, 128], strides = [1, 1, 1]} : vector<2x16x128xf32> to vector<2x1x128xf32>
    %4 = vector.extract_strided_slice %0 {offsets = [0, 0, 0], sizes = [2, 1, 128], strides = [1, 1, 1]} : vector<2x16x128xf32> to vector<2x1x128xf32>
    %5 = tpu.concatenate %3, %0, %4 in 1 : vector<2x1x128xf32>, vector<2x16x128xf32>, vector<2x1x128xf32> -> vector<2x18x128xf32>
    %6 = vector.extract_strided_slice %0 {offsets = [0, 0, 0], sizes = [2, 2, 128], strides = [1, 1, 1]} : vector<2x16x128xf32> to vector<2x2x128xf32>
    %7 = tpu.concatenate %0, %6 in 1 : vector<2x16x128xf32>, vector<2x2x128xf32> -> vector<2x18x128xf32>
    %8 = tpu.concatenate %2, %5, %7 in 2 : vector<2x18x128xf32>, vector<2x18x128xf32>, vector<2x18x128xf32> -> vector<2x18x384xf32>
    %c0_2 = arith.constant 0 : index
    %c0_3 = arith.constant 0 : index
    %9 = vector.load %arg1[%c0_2, %c0_3] : memref<384x128xf32, #tpu.memory_space<vmem>>, vector<384x128xf32>
    %10 = vector.shape_cast %9 : vector<384x128xf32> to vector<1x384x128xf32>
    %11 = vector.broadcast %10 : vector<1x384x128xf32> to vector<2x384x128xf32>
    "tpu.trace_start"() <{level = 10 : i32, message = "blk,bkc->blc"}> : () -> ()
    %cst = arith.constant dense<0.000000e+00> : vector<2x18x128xf32>
    %12 = tpu.matmul %8, %11, %cst {dimension_numbers = #tpu.dot_dimension_numbers<[2], [1], [1], [2], [0, 0, 0, 1, 1, 2], [0], [0]>} : vector<2x18x384xf32>, vector<2x384x128xf32>, vector<2x18x128xf32> -> vector<2x18x128xf32>
    "tpu.trace_stop"() : () -> ()
    %cst_4 = arith.constant dense<0.000000e+00> : vector<128xf32>
    %13 = vector.multi_reduction <add>, %12, %cst_4 [0, 1] : vector<2x18x128xf32> to vector<128xf32>
    %14 = vector.shape_cast %13 : vector<128xf32> to vector<1x1x128xf32>
    %cst_5 = arith.constant 3.600000e+01 : f32
    %15 = vector.broadcast %cst_5 : f32 to vector<1x1x128xf32>
    %16 = arith.divf %14, %15 : vector<1x1x128xf32>
    %17 = arith.mulf %12, %12 : vector<2x18x128xf32>
    %cst_6 = arith.constant dense<0.000000e+00> : vector<128xf32>
    %18 = vector.multi_reduction <add>, %17, %cst_6 [0, 1] : vector<2x18x128xf32> to vector<128xf32>
    %19 = vector.shape_cast %18 : vector<128xf32> to vector<1x1x128xf32>
    %cst_7 = arith.constant 3.600000e+01 : f32
    %20 = vector.broadcast %cst_7 : f32 to vector<1x1x128xf32>
    %21 = arith.divf %19, %20 : vector<1x1x128xf32>
    %22 = arith.mulf %16, %16 : vector<1x1x128xf32>
    %23 = arith.subf %21, %22 : vector<1x1x128xf32>
    %c0_8 = arith.constant 0 : index
    %c0_9 = arith.constant 0 : index
    %c0_10 = arith.constant 0 : index
    %24 = vector.load %arg2[%c0_8, %c0_9, %c0_10] : memref<1x1x128xf32, #tpu.memory_space<vmem>>, vector<1x1x128xf32>
    %cst_11 = arith.constant 9.99999974E-6 : f32
    %25 = vector.broadcast %cst_11 : f32 to vector<1x1x128xf32>
    %26 = arith.addf %23, %25 : vector<1x1x128xf32>
    %27 = math.rsqrt %26 : vector<1x1x128xf32>
    %28 = arith.mulf %24, %27 : vector<1x1x128xf32>
    %c0_12 = arith.constant 0 : index
    %c0_13 = arith.constant 0 : index
    %c0_14 = arith.constant 0 : index
    %29 = vector.load %arg3[%c0_12, %c0_13, %c0_14] : memref<1x1x128xf32, #tpu.memory_space<vmem>>, vector<1x1x128xf32>
    %30 = arith.mulf %16, %28 : vector<1x1x128xf32>
    %31 = arith.subf %29, %30 : vector<1x1x128xf32>
    %32 = vector.broadcast %28 : vector<1x1x128xf32> to vector<2x18x128xf32>
    %33 = arith.mulf %12, %32 : vector<2x18x128xf32>
    %34 = vector.broadcast %31 : vector<1x1x128xf32> to vector<2x18x128xf32>
    %35 = arith.addf %33, %34 : vector<2x18x128xf32>
    %cst_15 = arith.constant 0.000000e+00 : f32
    %36 = vector.broadcast %cst_15 : f32 to vector<2x18x128xf32>
    %37 = arith.cmpf ogt, %35, %36 : vector<2x18x128xf32>
    %cst_16 = arith.constant 0.000000e+00 : f32
    %38 = vector.broadcast %cst_16 : f32 to vector<2x18x128xf32>
    %39 = arith.minimumf %35, %38 : vector<2x18x128xf32>
    %40 = math.exp %39 : vector<2x18x128xf32>
    %cst_17 = arith.constant 1.000000e+00 : f32
    %41 = vector.broadcast %cst_17 : f32 to vector<2x18x128xf32>
    %42 = arith.subf %40, %41 : vector<2x18x128xf32>
    %43 = arith.select %37, %35, %42 : vector<2x18x128xi1>, vector<2x18x128xf32>
    %44 = tpu.iota {dimensions = array<i32: 1>} : vector<2x18x128xi32>
    %c0_i32 = arith.constant 0 : i32
    %45 = vector.broadcast %c0_i32 : i32 to vector<2x18x128xi32>
    %46 = arith.cmpi eq, %44, %45 : vector<2x18x128xi32>
    %c1_i32 = arith.constant 1 : i32
    %47 = tpu.dynamic_rotate %43 by %c1_i32 dim 1 : vector<2x18x128xf32>, i32 -> vector<2x18x128xf32>
    %cst_18 = arith.constant 0xFF800000 : f32
    %48 = vector.broadcast %cst_18 : f32 to vector<2x18x128xf32>
    %49 = arith.select %46, %48, %47 : vector<2x18x128xi1>, vector<2x18x128xf32>
    %c17_i32 = arith.constant 17 : i32
    %50 = vector.broadcast %c17_i32 : i32 to vector<2x18x128xi32>
    %51 = arith.cmpi eq, %44, %50 : vector<2x18x128xi32>
    %c17_i32_19 = arith.constant 17 : i32
    %52 = tpu.dynamic_rotate %43 by %c17_i32_19 dim 1 : vector<2x18x128xf32>, i32 -> vector<2x18x128xf32>
    %cst_20 = arith.constant 0xFF800000 : f32
    %53 = vector.broadcast %cst_20 : f32 to vector<2x18x128xf32>
    %54 = arith.select %51, %53, %52 : vector<2x18x128xi1>, vector<2x18x128xf32>
    %55 = arith.maximumf %49, %43 : vector<2x18x128xf32>
    %56 = arith.maximumf %55, %54 : vector<2x18x128xf32>
    %c0_21 = arith.constant 0 : index
    %c0_22 = arith.constant 0 : index
    %c0_23 = arith.constant 0 : index
    %57 = vector.load %arg5[%c0_21, %c0_22, %c0_23] : memref<2x18x128xf32, #tpu.memory_space<vmem>>, vector<2x18x128xf32>
    tpu.vector_store %arg5[%c0_21, %c0_22, %c0_23], %56 {strides = array<i32>} : memref<2x18x128xf32, #tpu.memory_space<vmem>>, vector<2x18x128xf32>,
    %c0_24 = arith.constant 0 : index
    %c0_25 = arith.constant 0 : index
    %c0_26 = arith.constant 0 : index
    %58 = tpu.strided_load %arg5[%c0_24, %c0_25, %c0_26] {strides = array<i32: 1, 2, 1>} : memref<2x18x128xf32, #tpu.memory_space<vmem>>, vector<2x9x128xf32>
    %c0_27 = arith.constant 0 : index
    %c0_28 = arith.constant 0 : index
    %c0_29 = arith.constant 0 : index
    %59 = vector.load %arg4[%c0_27, %c0_28, %c0_29] : memref<2x9x128xf32, #tpu.memory_space<vmem>>, vector<2x9x128xf32>
    tpu.vector_store %arg4[%c0_27, %c0_28, %c0_29], %58 {strides = array<i32>} : memref<2x9x128xf32, #tpu.memory_space<vmem>>, vector<2x9x128xf32>,
    return
  }
}

</mosaic_0001>

<bundles_post_ra>
// kernel: tpu_custom_call.1
= control target key start
LH: loop header
LB: loop body
LE: loop exit
PB: predicated region body
PF: predicated region fallthrough
CT: control target
= control target key end

     0   :  { %9 = vsyncpa [#allocation4], 0  ;;  %s1322_s0 = inlined_call_operand.hbm [shape: f32[2,16,128], index: 0, kind: input, shape index: {}]   ;;  %s1323_s1 = inlined_call_operand.hbm [shape: f32[384,128], index: 1, kind: input, shape index: {}]   ;;  %s1324_s2 = inlined_call_operand.vmem [shape: f32[1,1,128], index: 2, kind: input, shape index: {}]   ;;  %s1325_s3 = inlined_call_operand.vmem [shape: f32[1,1,128], index: 3, kind: input, shape index: {}]   ;;  %s1326_s4 = inlined_call_operand.vmem [shape: f32[2,9,128], index: 4, kind: output, shape index: {}]  }
   0x1   :  { %10 = vsyncpa [#allocation6], 0  ;;  %s1055_s15 = smov [#allocation3]   ;;  %s1007_s19 = scalar_lea.hbm %s1322_s0, 512 }
   0x2   :  { %s16_s16 = sshll.u32 %s1055_s15, 4  ;;  %p1008_p0 = scmp.ne.s32.totalorder %s1322_s0, %s1007_s19  ;;  %s17_s16 = int_to_ptr.vmem [resolvable:$true] %s16_s16 }
   0x3   :  { %p1011_p1 = scmp.lt.u32.totalorder %s1007_s19, %s1322_s0 }
   0x5   :  { %p1013_p2 = pnand %p1011_p1, %p1008_p0 }
   0x7   :  { %1016 = shalt.err (!%p1013_p2)
}
   0x8   :  { %s1017_s24 = scalar_lea.vmem %s17_s16, 512  ;;  %p1022_p4 = scmp.lt.s32.totalorder %s17_s16, %s17_s16 }
   0x9   :  { %p1018_p3 = scmp.ne.s32.totalorder %s17_s16, %s1017_s24  ;;  %p1023_p5 = scmp.lt.s32.totalorder %s1017_s24, %s1017_s24 }
   0xb   :  { %p1024_p6 = por %p1023_p5, %p1022_p4 }
   0xd   :  { %p1025_p7 = pnand %p1024_p6, %p1018_p3 }
   0xf   :  { %1028 = shalt.err (!%p1025_p7)
}
  0x10   :  { %s1056_s25 = smov 128   ;;  %s1057_s26 = smov 8  }
  0x11   :  { %22 = dma.hbm_to_vmem [thread:$0]  %s1322_s0, 512, %s17_s16, [#allocation4], %s1056_s25, %s1056_s25, %s1057_s26  }
  0x12   :  { %s1058_s29 = smov [#allocation5]   ;;  %s1029_s7 = scalar_lea.hbm %s1323_s1, 6144 }
  0x13   :  { %s28_s30 = sshll.u32 %s1058_s29, 4  ;;  %p1030_p8 = scmp.ne.s32.totalorder %s1323_s1, %s1029_s7  ;;  %s29_s30 = int_to_ptr.vmem [resolvable:$true] %s28_s30 }
  0x14   :  { %p1033_p9 = scmp.lt.u32.totalorder %s1029_s7, %s1323_s1 }
  0x16   :  { %p1035_p10 = pnand %p1033_p9, %p1030_p8 }
  0x18   :  { %1038 = shalt.err (!%p1035_p10)
}
  0x19   :  { %s1039_s12 = scalar_lea.vmem %s29_s30, 6144  ;;  %p1044_p12 = scmp.lt.s32.totalorder %s29_s30, %s29_s30 }
  0x1a   :  { %p1040_p11 = scmp.ne.s32.totalorder %s29_s30, %s1039_s12  ;;  %p1045_p13 = scmp.lt.s32.totalorder %s1039_s12, %s1039_s12 }
  0x1c   :  { %p1046_p0 = por %p1045_p13, %p1044_p12 }
  0x1e   :  { %p1047_p1 = pnand %p1046_p0, %p1040_p11 }
  0x20   :  { %1050 = shalt.err (!%p1047_p1)
}
  0x21   :  { %34 = dma.hbm_to_vmem [thread:$0]  %s1323_s1, 6144, %s29_s30, [#allocation6], %s1056_s25, %s1056_s25, %s1057_s26  }
  0x22   :  { %1051 = dma.done.wait [#allocation4], 512  }
  0x23   :  { %1052 = vsyncadd [#allocation4], 4294966784 }
  0x24   :  { %1053 = dma.done.wait [#allocation6], 6144  }
  0x25   :  { %1054 = vsyncadd [#allocation6], 4294961152  ;;  %v1059_v0 = vmov 0.0|0.0   ;;  %vm1060_vm0 = vmmov 0   ;;  %v1061_v1 = vmov 0.0   ;;  %v99_v2 = vld [vmem:[#allocation5 + $0x80] sm:$0xff] }
  0x26   :  { %906 = vmatprep.subr.bf16.mxu1 %v1059_v0  ;;  %824 = vmatprep.mubr.msk.f32.mxu1 %vm1060_vm0, %v1061_v1  ;;  %v100_v3 = vld [vmem:[#allocation5 + $0x88] sm:$0xff]  ;;  %v83_v4 = vld [vmem:[#allocation5] sm:$0xff]  ;;  %v101_v11 = vld [vmem:[#allocation5 + $0x90] sm:$0xff]  ;;  %vm72_vm1 = vcmask 1040384   ;;  %vm57_vm2 = vcmask 1041408   ;;  %vm562_vm4 = vcmask 1047554  }
  0x27   :  { %v1114_v5 = vpack.c.bf16 %v100_v3, %v99_v2  ;;  %v84_v6 = vld [vmem:[#allocation5 + $0x8] sm:$0xff]  ;;  %v115_v7 = vld [vmem:[#allocation5 + $0x100] sm:$0xff]  ;;  %v102_v12 = vld [vmem:[#allocation5 + $0x98] sm:$0xff]  ;;  %vm581_vm5 = vcmask 1046528  }
  0x28   :  { %v116_v8 = vld [vmem:[#allocation5 + $0x108] sm:$0xff]  ;;  %v1116_v9 = vpack.c.bf16 %v84_v6, %v83_v4  ;;  %v85_v13 = vld [vmem:[#allocation5 + $0x10] sm:$0xff]  ;;  %v1121_v14 = vpack.c.bf16 %v102_v12, %v101_v11  ;;  %v86_v15 = vld [vmem:[#allocation5 + $0x18] sm:$0xff] }
  0x29   :  { %v1118_v10 = vpack.c.bf16 %v116_v8, %v115_v7  ;;  %875 = vmatprep.subr.bf16.mxu0 %v1114_v5  ;;  %v117_v16 = vld [vmem:[#allocation5 + $0x110] sm:$0xff]  ;;  %v118_v17 = vld [vmem:[#allocation5 + $0x118] sm:$0xff]  ;;  %v1125_v18 = vpack.c.bf16 %v86_v15, %v85_v13  ;;  %v103_v20 = vld [vmem:[#allocation5 + $0xa0] sm:$0xff] }
  0x2a   :  { %877 = vmatpush3.bf16.msra.mxu0 %v1116_v9  ;;  %v1127_v19 = vpack.c.bf16 %v118_v17, %v117_v16  ;;  %v104_v21 = vld [vmem:[#allocation5 + $0xa8] sm:$0xff]  ;;  %v87_v22 = vld [vmem:[#allocation5 + $0x20] sm:$0xff]  ;;  %v105_v27 = vld [vmem:[#allocation5 + $0xb0] sm:$0xff] }
  0x2b   :  { %908 = vmatpush3.bf16.msra.mxu1 %v1118_v10  ;;  %879 = vmatprep.subr.bf16.mxu0 %v1121_v14  ;;  %v1131_v23 = vpack.c.bf16 %v104_v21, %v103_v20  ;;  %v88_v24 = vld [vmem:[#allocation5 + $0x28] sm:$0xff]  ;;  %v119_v25 = vld [vmem:[#allocation5 + $0x120] sm:$0xff]  ;;  %v106_v28 = vld [vmem:[#allocation5 + $0xb8] sm:$0xff] }
  0x2c   :  { %909 = vmatprep.subr.bf16.mxu1 %v1059_v0  ;;  %v120_v26 = vld [vmem:[#allocation5 + $0x128] sm:$0xff]  ;;  %v1135_v29 = vpack.c.bf16 %v88_v24, %v87_v22  ;;  %v89_v31 = vld [vmem:[#allocation5 + $0x30] sm:$0xff]  ;;  %v1141_v32 = vpack.c.bf16 %v106_v28, %v105_v27  ;;  %v90_v33 = vld [vmem:[#allocation5 + $0x38] sm:$0xff] }
  0x2d   :  { %v1137_v30 = vpack.c.bf16 %v120_v26, %v119_v25  ;;  %v121_v34 = vld [vmem:[#allocation5 + $0x130] sm:$0xff]  ;;  %v122_v35 = vld [vmem:[#allocation5 + $0x138] sm:$0xff]  ;;  %v107_v36 = vld [vmem:[#allocation5 + $0xc0] sm:$0xff]  ;;  %v1145_v38 = vpack.c.bf16 %v90_v33, %v89_v31 }
  0x2e   :  { %881 = vmatpush3.bf16.msra.mxu0 %v1125_v18  ;;  %v108_v37 = vld [vmem:[#allocation5 + $0xc8] sm:$0xff]  ;;  %v1147_v39 = vpack.c.bf16 %v122_v35, %v121_v34  ;;  %v91_v40 = vld [vmem:[#allocation5 + $0x40] sm:$0xff]  ;;  %v109_v45 = vld [vmem:[#allocation5 + $0xd0] sm:$0xff] }
  0x2f   :  { %911 = vmatpush3.bf16.msra.mxu1 %v1127_v19  ;;  %883 = vmatprep.subr.bf16.mxu0 %v1131_v23  ;;  %v1151_v41 = vpack.c.bf16 %v108_v37, %v107_v36  ;;  %v92_v42 = vld [vmem:[#allocation5 + $0x48] sm:$0xff]  ;;  %v123_v43 = vld [vmem:[#allocation5 + $0x140] sm:$0xff]  ;;  %v110_v46 = vld [vmem:[#allocation5 + $0xd8] sm:$0xff] }
  0x30   :  { %912 = vmatprep.subr.bf16.mxu1 %v1059_v0  ;;  %v124_v44 = vld [vmem:[#allocation5 + $0x148] sm:$0xff]  ;;  %v1153_v47 = vld [vmem:[#allocation3] sm:$0xff]  ;;  %v1159_v49 = vpack.c.bf16 %v92_v42, %v91_v40  ;;  %v93_v51 = vld [vmem:[#allocation5 + $0x50] sm:$0xff]  ;;  %v1167_v54 = vpack.c.bf16 %v110_v46, %v109_v45 }
  0x31   :  { %v1155_v48 = vld [vmem:[#allocation3 + $0x8] sm:$0xff]  ;;  %v1161_v50 = vpack.c.bf16 %v124_v44, %v123_v43  ;;  %v73_v53 = vrot.slane %v1153_v47, 7  ;;  %v94_v55 = vld [vmem:[#allocation5 + $0x58] sm:$0xff]  ;;  %v125_v56 = vld [vmem:[#allocation5 + $0x150] sm:$0xff]  ;;  %v58_v25 = vrot.slane %v1153_v47, 6 }
  0x32   :  { %885 = vmatpush3.bf16.msra.mxu0 %v1135_v29  ;;  %v68_v52 = vrot.slane %v1155_v48, 7  ;;  %v126_v57 = vld [vmem:[#allocation5 + $0x158] sm:$0xff]  ;;  %v111_v58 = vld [vmem:[#allocation5 + $0xe0] sm:$0xff]  ;;  %v112_v59 = vld [vmem:[#allocation5 + $0xe8] sm:$0xff]  ;;  %v1172_v61 = vpack.c.bf16 %v94_v55, %v93_v51  ;;  %v51_v24 = vrot.slane %v1155_v48, 6 }
  0x33   :  { %914 = vmatpush3.bf16.msra.mxu1 %v1137_v30  ;;  %887 = vmatprep.subr.bf16.mxu0 %v1141_v32  ;;  %v1174_v62 = vpack.c.bf16 %v126_v57, %v125_v56  ;;  %v95_v63 = vld [vmem:[#allocation5 + $0x60] sm:$0xff]  ;;  %v1178_v2 = vpack.c.bf16 %v112_v59, %v111_v58  ;;  %v96_v3 = vld [vmem:[#allocation5 + $0x68] sm:$0xff]  ;;  %v113_v7 = vld [vmem:[#allocation5 + $0xf0] sm:$0xff] }
  0x34   :  { %915 = vmatprep.subr.bf16.mxu1 %v1059_v0  ;;  %v81_v60 = vsel %vm72_vm1, %v68_v52, %v73_v53  ;;  %v127_v4 = vld [vmem:[#allocation5 + $0x160] sm:$0xff]  ;;  %v128_v6 = vld [vmem:[#allocation5 + $0x168] sm:$0xff]  ;;  %v114_v8 = vld [vmem:[#allocation5 + $0xf8] sm:$0xff]  ;;  %v1182_v11 = vpack.c.bf16 %v96_v3, %v95_v63  ;;  %v66_v26 = vsel %vm57_vm2, %v51_v24, %v58_v25  ;;  %v74_v27 = vsel %vm72_vm1, %v73_v53, %v68_v52 }
  0x35   :  { %195 = vmatprep.mubr.f32.mxu0 %v81_v60  ;;  %v1184_v12 = vpack.c.bf16 %v128_v6, %v127_v4  ;;  %v97_v13 = vld [vmem:[#allocation5 + $0x70] sm:$0xff]  ;;  %v1188_v15 = vpack.c.bf16 %v114_v8, %v113_v7  ;;  %v98_v16 = vld [vmem:[#allocation5 + $0x78] sm:$0xff]  ;;  %v59_v33 = vsel %vm57_vm2, %v58_v25, %v51_v24 }
  0x36   :  { %889 = vmatpush3.bf16.msra.mxu0 %v1145_v38  ;;  %v129_v17 = vld [vmem:[#allocation5 + $0x170] sm:$0xff]  ;;  %v130_v20 = vld [vmem:[#allocation5 + $0x178] sm:$0xff]  ;;  %v904_v21 = vpack.c.bf16 %v98_v16, %v97_v13 }
  0x37   :  { %917 = vmatpush3.bf16.msra.mxu1 %v1147_v39  ;;  %891 = vmatprep.subr.bf16.mxu0 %v1151_v41  ;;  %v1192_v22 = vpack.c.bf16 %v130_v20, %v129_v17  ;;  %v47_v28 = vld [vmem:[#allocation3 + $0x10] sm:$0xff]  ;;  %v48_v31 = vld [vmem:[#allocation3 + $0x18] sm:$0xff] }
  0x38   :  { %918 = vmatprep.subr.bf16.mxu1 %v1059_v0  ;;  %v69_v34 = vrot.slane %v48_v31, 7 }
  0x3a   :  { %893 = vmatpush3.bf16.msra.mxu0 %v1159_v49 }
  0x3b   :  { %920 = vmatpush3.bf16.msra.mxu1 %v1161_v50  ;;  %895 = vmatprep.subr.bf16.mxu0 %v1167_v54 }
  0x3c   :  { %921 = vmatprep.subr.bf16.mxu1 %v1059_v0 }
  0x3e   :  { %897 = vmatpush3.bf16.msra.mxu0 %v1172_v61 }
  0x3f   :  { %923 = vmatpush3.bf16.msra.mxu1 %v1174_v62  ;;  %899 = vmatprep.subr.bf16.mxu0 %v1178_v2 }
  0x40   :  { %924 = vmatprep.subr.bf16.mxu1 %v1059_v0 }
  0x42   :  { %901 = vmatpush3.bf16.msra.mxu0 %v1182_v11 }
  0x43   :  { %926 = vmatpush3.bf16.msra.mxu1 %v1184_v12  ;;  %903 = vmatprep.subr.bf16.mxu0 %v1188_v15 }
  0x44   :  { %927 = vmatprep.subr.bf16.mxu1 %v1059_v0 }
  0x46   :  { %905 = vmatpush3.bf16.msra.mxu0 %v904_v21 }
  0x47   :  { %929 = vmatpush3.bf16.msra.mxu1 %v1192_v22  ;;  %931 = vmatprep.subr.bf16.mxu0 %v1114_v5  ;;  %v75_v5 = vrot.slane %v47_v28, 7 }
  0x48   :  { %962 = vmatprep.subr.bf16.mxu1 %v1059_v0 }
  0x49   :  { %196 = vmatmul.mubr.f32.vlgmr.msra.gmra.mrb[0].mxu0 %v66_v26 }
  0x4a   :  { %825 = vmatmul.mubr.f32.vlgmr.msra.gmra.mrb[0].mxu1 %v1153_v47  ;;  %933 = vmatpush3.bf16.msra.mxu0 %v1116_v9  ;;  %v82_v9 = vsel %vm72_vm1, %v69_v34, %v75_v5 }
  0x4b   :  { %200 = vmatprep.mubr.f32.mxu0 %v74_v27  ;;  %964 = vmatpush3.bf16.msra.mxu1 %v1118_v10  ;;  %v52_v10 = vrot.slane %v48_v31, 6 }
  0x4c   :  { %935 = vmatprep.subr.bf16.mxu0 %v1121_v14  ;;  %827 = vmatprep.mubr.msk.f32.mxu1 %vm1060_vm0, %v1061_v1  ;;  %v60_v14 = vrot.slane %v47_v28, 6 }
  0x4d   :  { %965 = vmatprep.subr.bf16.mxu1 %v1059_v0  ;;  %201 = vmatmul.mubr.f32.gmra.mrb[2].mxu0 %v59_v33 }
  0x4e   :  { %828 = vmatmul.mubr.f32.gmra.mrb[2].mxu1 %v1155_v48  ;;  %937 = vmatpush3.bf16.msra.mxu0 %v1125_v18  ;;  %v67_v18 = vsel %vm57_vm2, %v52_v10, %v60_v14 }
  0x4f   :  { %205 = vmatprep.mubr.f32.mxu0 %v81_v60  ;;  %967 = vmatpush3.bf16.msra.mxu1 %v1127_v19  ;;  %v76_v19 = vsel %vm72_vm1, %v75_v5, %v69_v34 }
  0x50   :  { %939 = vmatprep.subr.bf16.mxu0 %v1131_v23  ;;  %830 = vmatprep.mubr.msk.f32.mxu1 %vm1060_vm0, %v1061_v1  ;;  %v61_v23 = vsel %vm57_vm2, %v60_v14, %v52_v10 }
  0x51   :  { %968 = vmatprep.subr.bf16.mxu1 %v1059_v0  ;;  %206 = vmatmul.mubr.f32.gmra.mrb[4].mxu0 %v51_v24 }
  0x52   :  { %831 = vmatmul.mubr.f32.gmra.mrb[4].mxu1 %v1153_v47  ;;  %941 = vmatpush3.bf16.msra.mxu0 %v1135_v29 }
  0x53   :  { %355 = vmatprep.mubr.f32.mxu0 %v82_v9  ;;  %970 = vmatpush3.bf16.msra.mxu1 %v1137_v30 }
  0x54   :  { %943 = vmatprep.subr.bf16.mxu0 %v1141_v32  ;;  %971 = vmatprep.subr.bf16.mxu1 %v1059_v0 }
  0x55   :  { %865 = vmatprep.mubr.msk.f32.mxu1 %vm1060_vm0, %v1061_v1 }
  0x56   :  { %945 = vmatpush3.bf16.msra.mxu0 %v1145_v38 }
  0x57   :  { %973 = vmatpush3.bf16.msra.mxu1 %v1147_v39  ;;  %947 = vmatprep.subr.bf16.mxu0 %v1151_v41 }
  0x58   :  { %974 = vmatprep.subr.bf16.mxu1 %v1059_v0 }
  0x5a   :  { %949 = vmatpush3.bf16.msra.mxu0 %v1159_v49 }
  0x5b   :  { %976 = vmatpush3.bf16.msra.mxu1 %v1161_v50  ;;  %951 = vmatprep.subr.bf16.mxu0 %v1167_v54 }
  0x5c   :  { %977 = vmatprep.subr.bf16.mxu1 %v1059_v0 }
  0x5e   :  { %953 = vmatpush3.bf16.msra.mxu0 %v1172_v61 }
  0x5f   :  { %979 = vmatpush3.bf16.msra.mxu1 %v1174_v62  ;;  %955 = vmatprep.subr.bf16.mxu0 %v1178_v2 }
  0x60   :  { %980 = vmatprep.subr.bf16.mxu1 %v1059_v0 }
  0x62   :  { %957 = vmatpush3.bf16.msra.mxu0 %v1182_v11 }
  0x63   :  { %982 = vmatpush3.bf16.msra.mxu1 %v1184_v12  ;;  %959 = vmatprep.subr.bf16.mxu0 %v1188_v15 }
  0x64   :  { %983 = vmatprep.subr.bf16.mxu1 %v1059_v0 }
  0x66   :  { %961 = vmatpush3.bf16.msra.mxu0 %v904_v21 }
  0x67   :  { %985 = vmatpush3.bf16.msra.mxu1 %v1192_v22 }
  0x69   :  { %356 = vmatmul.mubr.f32.vlgmr.msra.gmra.mrb[6].mxu0 %v67_v18 }
  0x6a   :  { %866 = vmatmul.mubr.f32.vlgmr.msra.gmra.mrb[6].mxu1 %v47_v28  ;;  %360 = vmatprep.mubr.f32.mxu0 %v76_v19 }
  0x6b   :  { %868 = vmatprep.mubr.msk.f32.mxu1 %vm1060_vm0, %v1061_v1 }
  0x6d   :  { %361 = vmatmul.mubr.f32.gmra.mrb[8].mxu0 %v61_v23 }
  0x6e   :  { %869 = vmatmul.mubr.f32.gmra.mrb[8].mxu1 %v48_v31  ;;  %365 = vmatprep.mubr.f32.mxu0 %v82_v9 }
  0x6f   :  { %871 = vmatprep.mubr.msk.f32.mxu1 %vm1060_vm0, %v1061_v1 }
  0x71   :  { %366 = vmatmul.mubr.f32.gmra.mrb[10].mxu0 %v52_v10 }
  0x72   :  { %872 = vmatmul.mubr.f32.gmra.mrb[10].mxu1 %v47_v28 }
 0x11c   :  { %v704_v0 = vpop.f32.mrb[0].mxu0 }
 0x11d   :  { %v277_v29 = vpop.f32.mrb[0].mxu1  ;;  %v705_v30 = vpop.f32.mrb[1].mxu0 }
 0x11e   :  { %v826_v32 = vpop.f32.mrb[1].mxu1  ;;  %v706_v35 = vadd.f32 %v705_v30, %v704_v0 }
 0x120   :  { %v1250_v36 = vadd.f32 %v706_v35, %v277_v29  ;;  %v707_v37 = vpop.f32.mrb[2].mxu0 }
 0x121   :  { %v282_v38 = vpop.f32.mrb[2].mxu1  ;;  %v708_v39 = vpop.f32.mrb[3].mxu0 }
 0x122   :  { %v829_v40 = vpop.f32.mrb[3].mxu1  ;;  %v709_v41 = vadd.f32 %v708_v39, %v707_v37  ;;  %v466_v46 = vmul.f32 %v1250_v36, %v1250_v36 }
 0x124   :  { %v1252_v42 = vadd.f32 %v709_v41, %v282_v38  ;;  %v710_v43 = vpop.f32.mrb[4].mxu0  ;;  %v496_v41 = vlaneseq }
 0x125   :  { %v287_v44 = vpop.f32.mrb[4].mxu1  ;;  %v711_v45 = vpop.f32.mrb[5].mxu0 }
 0x126   :  { %v832_v1 = vpop.f32.mrb[5].mxu1  ;;  %v451_v47 = vadd.f32 %v1252_v42, %v1250_v36  ;;  %v467_v48 = vmul.f32 %v1252_v42, %v1252_v42  ;;  %v712_v49 = vadd.f32 %v711_v45, %v710_v43  ;;  %v1269_v43 = vshrl.u32 %v496_v41, 7 }
 0x128   :  { %v472_v50 = vadd.f32 %v467_v48, %v466_v46  ;;  %v1260_v51 = vadd.f32 %v712_v49, %v287_v44  ;;  %v488_v44 = vld [vmem:[%s1324_s2] sm:$0x1]  ;;  %v498_v45 = vsub.s32 0, %v1269_v43  ;;  %vm559_vm3 = vcmp.eq.s32.totalorder %v1269_v43, 0 }
 0x12a   :  { %v452_v52 = vsel %vm57_vm2, %v1260_v51, 0.0  ;;  %v468_v53 = vmul.f32 %v1260_v51, %v1260_v51 }
 0x12b   :  { %v453_v54 = vadd.f32 %v452_v52, %v451_v47  ;;  %v492_v47 = vld [vmem:[%s1325_s3] sm:$0x1] }
 0x12c   :  { %v473_v55 = vsel %vm57_vm2, %v468_v53, 0.0 }
 0x12d   :  { %v474_v56 = vadd.f32 %v473_v55, %v472_v50 }
 0x13c   :  { %v764_v57 = vpop.f32.mrb[6].mxu0 }
 0x13d   :  { %v765_v58 = vpop.f32.mrb[7].mxu0  ;;  %v437_v59 = vpop.f32.mrb[6].mxu1 }
 0x13e   :  { %v766_v60 = vadd.f32 %v765_v58, %v764_v57  ;;  %v867_v61 = vpop.f32.mrb[7].mxu1 }
 0x140   :  { %v438_v62 = vadd.f32 %v766_v60, %v437_v59  ;;  %v767_v63 = vpop.f32.mrb[8].mxu0 }
 0x141   :  { %v768_v2 = vpop.f32.mrb[9].mxu0  ;;  %v442_v3 = vpop.f32.mrb[8].mxu1 }
 0x142   :  { %v454_v4 = vadd.f32 %v453_v54, %v438_v62  ;;  %v469_v6 = vmul.f32 %v438_v62, %v438_v62  ;;  %v769_v7 = vadd.f32 %v768_v2, %v767_v63  ;;  %v870_v8 = vpop.f32.mrb[9].mxu1 }
 0x144   :  { %v475_v11 = vadd.f32 %v474_v56, %v469_v6  ;;  %v443_v12 = vadd.f32 %v769_v7, %v442_v3  ;;  %v770_v13 = vpop.f32.mrb[10].mxu0 }
 0x145   :  { %v771_v15 = vpop.f32.mrb[11].mxu0  ;;  %v447_v16 = vpop.f32.mrb[10].mxu1 }
 0x146   :  { %v455_v17 = vadd.f32 %v454_v4, %v443_v12  ;;  %v470_v20 = vmul.f32 %v443_v12, %v443_v12  ;;  %v772_v21 = vadd.f32 %v771_v15, %v770_v13  ;;  %v873_v22 = vpop.f32.mrb[11].mxu1 }
 0x148   :  { %v476_v24 = vadd.f32 %v475_v11, %v470_v20  ;;  %v448_v25 = vadd.f32 %v772_v21, %v447_v16  ;;  %v1282_v16 = vadd.s32 16, %v1269_v43 }
 0x14a   :  { %v456_v26 = vsel %vm57_vm2, %v448_v25, 0.0  ;;  %v471_v27 = vmul.f32 %v448_v25, %v448_v25  ;;  %vm606_vm9 = vcmp.eq.s32.totalorder %v1282_v16, 17 }
 0x14b   :  { %v457_v28 = vadd.f32 %v456_v26, %v455_v17 }
 0x14c   :  { %v477_v31 = vsel %vm57_vm2, %v471_v27, 0.0 }
 0x14d   :  { %v458_v33 = vrot.slane %v457_v28, 4  ;;  %v478_v34 = vadd.f32 %v477_v31, %v476_v24 }
 0x14f   :  { %v459_v5 = vadd.f32 %v458_v33, %v457_v28  ;;  %v479_v9 = vrot.slane %v478_v34, 4 }
 0x151   :  { %v460_v10 = vrot.slane %v459_v5, 2  ;;  %v480_v14 = vadd.f32 %v479_v9, %v478_v34 }
 0x153   :  { %v461_v18 = vadd.f32 %v460_v10, %v459_v5  ;;  %v481_v19 = vrot.slane %v480_v14, 2 }
 0x155   :  { %v462_v23 = vrot.slane %v461_v18, 1  ;;  %v482_v0 = vadd.f32 %v481_v19, %v480_v14 }
 0x157   :  { %v463_v29 = vadd.f32 %v462_v23, %v461_v18  ;;  %v483_v30 = vrot.slane %v482_v0, 1 }
 0x159   :  { %v465_v32 = vmul.f32 0.027777778, %v463_v29  ;;  %v484_v35 = vadd.f32 %v483_v30, %v482_v0 }
 0x15b   :  { %v485_v37 = vmul.f32 0.027777778, %v484_v35  ;;  %v486_v38 = vmul.f32 %v465_v32, %v465_v32 }
 0x15d   :  { %v487_v39 = vsub.f32 %v485_v37, %v486_v38 }
 0x15f   :  { %v489_v40 = vadd.f32 1e-05, %v487_v39 }
 0x161   :  { %993 = vrsqrt.f32 %v489_v40 }
 0x16b   :  { %v994_v1 = vpop.eup %993 }
 0x16c   :  { %v491_v46 = vmul.f32 %v994_v1, %v488_v44 }
 0x16e   :  { %v493_v48 = vmul.f32 %v491_v46, %v465_v32  ;;  %v499_v49 = vrot.slane %v491_v46, %v498_v45 }
 0x170   :  { %v494_v50 = vsub.f32 %v492_v47, %v493_v48  ;;  %v501_v52 = vmul.f32 %v499_v49, %v1250_v36  ;;  %v502_v53 = vmul.f32 %v499_v49, %v1252_v42  ;;  %v503_v54 = vmul.f32 %v499_v49, %v1260_v51 }
 0x171   :  { %v504_v55 = vmul.f32 %v499_v49, %v438_v62  ;;  %v505_v56 = vmul.f32 %v499_v49, %v443_v12  ;;  %v506_v57 = vmul.f32 %v499_v49, %v448_v25 }
 0x172   :  { %v511_v58 = vrot.slane %v494_v50, %v498_v45 }
 0x174   :  { %v513_v59 = vadd.f32 %v511_v58, %v501_v52  ;;  %v514_v60 = vadd.f32 %v511_v58, %v502_v53  ;;  %v515_v61 = vadd.f32 %v511_v58, %v503_v54  ;;  %v516_v63 = vadd.f32 %v511_v58, %v504_v55 }
 0x175   :  { %v517_v2 = vadd.f32 %v511_v58, %v505_v56  ;;  %v518_v3 = vadd.f32 %v511_v58, %v506_v57 }
 0x176   :  { %v525_v4 = vmin.f32 %v513_v59, 0.0  ;;  %v526_v6 = vmin.f32 %v514_v60, 0.0  ;;  %v527_v7 = vmin.f32 %v515_v61, 0.0  ;;  %v528_v8 = vmin.f32 %v516_v63, 0.0 }
 0x177   :  { %v529_v11 = vmin.f32 %v517_v2, 0.0  ;;  %v530_v36 = vmin.f32 %v518_v3, 0.0  ;;  %vm519_vm6 = vcmp.gt.f32.partialorder %v513_v59, 0.0  ;;  %vm520_vm7 = vcmp.gt.f32.partialorder %v514_v60, 0.0 }
 0x178   :  { %v531_v13 = vmul.f32 1.442695, %v525_v4  ;;  %v533_v42 = vmul.f32 1.442695, %v526_v6  ;;  %v535_v15 = vmul.f32 1.442695, %v527_v7 }
 0x179   :  { %v537_v51 = vmul.f32 1.442695, %v528_v8  ;;  %v539_v62 = vmul.f32 1.442695, %v529_v11  ;;  %v541_v12 = vmul.f32 1.442695, %v530_v36 }
 0x17a   :  { %995 = vpow2.f32 %v531_v13  ;;  %vm521_vm8 = vcmp.gt.f32.partialorder %v515_v61, 0.0  ;;  %vm522_vm10 = vcmp.gt.f32.partialorder %v516_v63, 0.0  ;;  %vm523_vm11 = vcmp.gt.f32.partialorder %v517_v2, 0.0 }
 0x17b   :  { %997 = vpow2.f32 %v533_v42  ;;  %vm524_vm12 = vcmp.gt.f32.partialorder %v518_v3, 0.0 }
 0x17c   :  { %999 = vpow2.f32 %v535_v15 }
 0x17d   :  { %1001 = vpow2.f32 %v537_v51 }
 0x17e   :  { %1003 = vpow2.f32 %v539_v62 }
 0x17f   :  { %1005 = vpow2.f32 %v541_v12 }
 0x184   :  { %v996_v17 = vpop.eup %995 }
 0x185   :  { %v998_v20 = vpop.eup %997  ;;  %v666_v21 = vadd.f32 -1.0, %v996_v17 }
 0x186   :  { %v1000_v22 = vpop.eup %999  ;;  %v667_v24 = vadd.f32 -1.0, %v998_v20 }
 0x187   :  { %v1002_v25 = vpop.eup %1001  ;;  %v668_v26 = vadd.f32 -1.0, %v1000_v22  ;;  %v549_v27 = vsel %vm519_vm6, %v513_v59, %v666_v21 }
 0x188   :  { %v1004_v28 = vpop.eup %1003  ;;  %v669_v31 = vadd.f32 -1.0, %v1002_v25  ;;  %v550_v33 = vsel %vm520_vm7, %v514_v60, %v667_v24  ;;  %v563_v34 = vrot.slane %v549_v27, 6  ;;  %v611_v5 = vrot.slane %v549_v27, 1 }
 0x189   :  { %v1006_v9 = vpop.eup %1005  ;;  %v670_v10 = vadd.f32 -1.0, %v1004_v28  ;;  %v551_v14 = vsel %vm521_vm8, %v515_v61, %v668_v26  ;;  %v567_v18 = vrot.slane %v550_v33, 6  ;;  %v612_v19 = vrot.slane %v550_v33, 1 }
 0x18a   :  { %v671_v23 = vadd.f32 -1.0, %v1006_v9  ;;  %v552_v0 = vsel %vm522_vm10, %v516_v63, %v669_v31  ;;  %v564_v29 = vsel %vm562_vm4, %v563_v34, %v551_v14 }
 0x18b   :  { %v553_v30 = vsel %vm523_vm11, %v517_v2, %v670_v10  ;;  %v565_v32 = vrot.slane %v552_v0, 6  ;;  %v569_v35 = vrot.slane %v564_v29, 6  ;;  %v571_v37 = vsel %vm562_vm4, %v567_v18, %v563_v34 }
 0x18c   :  { %v554_v38 = vsel %vm524_vm12, %v518_v3, %v671_v23  ;;  %v568_v39 = vrot.slane %v553_v30, 6  ;;  %v582_v40 = vrot.slane %v564_v29, 1  ;;  %v583_v41 = vrot.slane %v571_v37, 1 }
 0x18d   :  { %v566_v44 = vsel %vm562_vm4, %v565_v32, %v554_v38  ;;  %v573_v45 = vsel %vm562_vm4, %v569_v35, %v567_v18  ;;  %v613_v1 = vsel %vm581_vm5, %v611_v5, %v612_v19  ;;  %v615_v46 = vrot.slane %v552_v0, 1 }
 0x18e   :  { %v570_v47 = vrot.slane %v566_v44, 6  ;;  %v572_v48 = vsel %vm562_vm4, %v568_v39, %v565_v32  ;;  %v584_v49 = vsel %vm581_vm5, %v582_v40, %v583_v41  ;;  %v585_v50 = vrot.slane %v573_v45, 1 }
 0x18f   :  { %v587_v52 = vrot.slane %v566_v44, 1  ;;  %v588_v53 = vrot.slane %v572_v48, 1  ;;  %v598_v54 = vsel %vm559_vm3, -inf, %v584_v49  ;;  %v614_v55 = vsel %vm581_vm5, %v612_v19, %v582_v40 }
 0x190   :  { %v574_v56 = vsel %vm562_vm4, %v570_v47, %v568_v39  ;;  %v586_v57 = vsel %vm581_vm5, %v583_v41, %v585_v50  ;;  %v616_v58 = vrot.slane %v553_v30, 1  ;;  %v627_v61 = vsel %vm606_vm9, -inf, %v582_v40 }
 0x191   :  { %v589_v59 = vsel %vm581_vm5, %v587_v52, %v588_v53  ;;  %v590_v60 = vrot.slane %v574_v56, 1  ;;  %v631_v63 = vmax.f32 %v598_v54, %v549_v27  ;;  %v632_v6 = vmax.f32 %v586_v57, %v550_v33 }
 0x192   :  { %v601_v2 = vsel %vm559_vm3, -inf, %v589_v59  ;;  %v617_v3 = vsel %vm581_vm5, %v615_v46, %v616_v58  ;;  %v618_v4 = vsel %vm581_vm5, %v616_v58, %v587_v52  ;;  %v633_v8 = vmax.f32 %v585_v50, %v551_v14 }
 0x193   :  { %v591_v7 = vsel %vm581_vm5, %v588_v53, %v590_v60  ;;  %v634_v11 = vmax.f32 %v601_v2, %v552_v0  ;;  %v636_v36 = vmax.f32 %v590_v60, %v554_v38  ;;  %v630_v13 = vsel %vm606_vm9, -inf, %v587_v52 }
 0x194   :  { %v635_v42 = vmax.f32 %v591_v7, %v553_v30  ;;  %v637_v15 = vmax.f32 %v631_v63, %v613_v1  ;;  %v638_v51 = vmax.f32 %v632_v6, %v614_v55  ;;  %v639_v62 = vmax.f32 %v633_v8, %v627_v61 }
 0x195   :  { %v640_v12 = vmax.f32 %v634_v11, %v617_v3  ;;  %v642_v43 = vmax.f32 %v636_v36, %v630_v13 }
 0x196   :  { %v641_v17 = vmax.f32 %v635_v42, %v618_v4  ;;  %643 = vst [vmem:[#allocation2] sm:$0xff] %v637_v15  ;;  %644 = vst [vmem:[#allocation2 + $0x8] sm:$0xff] %v638_v51 }
 0x197   :  { %645 = vst [vmem:[#allocation2 + $0x10] sm:$0x3] %v639_v62  ;;  %646 = vst [vmem:[#allocation2 + $0x18] sm:$0xff] %v640_v12 }
 0x198   :  { %648 = vst [vmem:[#allocation2 + $0x28] sm:$0x3] %v642_v43  ;;  %647 = vst [vmem:[#allocation2 + $0x20] sm:$0xff] %v641_v17 }
 0x19d   :  { %v649_v20 = vld [vmem:[#allocation2] ss:$2 sm:$0xff] }
 0x19e   :  { %v651_v21 = vld [vmem:[#allocation2 + $0x10] ss:$2 sm:$0x1]  ;;  %656 = vst [vmem:[%s1326_s4] sm:$0xff] %v649_v20 }
 0x19f   :  { %v655_v22 = vld [vmem:[#allocation2 + $0x28] ss:$2 sm:$0x1]  ;;  %v653_v16 = vld [vmem:[#allocation2 + $0x18] ss:$2 sm:$0xff] }
 0x1a0   :  { %657 = vst [vmem:[%s1326_s4 + $0x8] sm:$0x1] %v651_v21  ;;  %659 = vst [vmem:[%s1326_s4 + $0x18] sm:$0x1] %v655_v22 }
 0x1a1   :  { %658 = vst [vmem:[%s1326_s4 + $0x10] sm:$0xff] %v653_v16 }
 0x1a2   :  { %664 = vsyncpa [#allocation4], 1 }
 0x1a3   :  { %665 = vsyncpa [#allocation6], 1 }

</bundles_post_ra>
